<compile_context>
chip_gen: v7x
topology: tpu7x:2x2x1
jax: 0.10.0
libtpu: 0.0.40
codegen_flags: <defaults>
</compile_context>

<pallas_src>
import math
from functools import partial

import jax
import jax.numpy as jnp
from jax.experimental import pallas as pl
from jax.experimental.pallas import tpu as pltpu


_LANE = 128
_MAX_LANE_WIDTH = 32 * 1024            # cap for the lane-dense last dim
_STEP_PAYLOAD_BUDGET = 4 * 1024 * 1024  # bytes of x+out(+bits) per grid step
                                        # (double-buffered -> ~8 MiB; safe on
                                        # v5e/v6e/v7x VMEM with headroom)


def make_pe_table(d_model: int, max_len: int = 3072) -> jnp.ndarray:
    """Sinusoidal table, shape (max_len, d_model) (== pe[:, 0, :] in PyTorch)."""
    position = jnp.arange(max_len, dtype=jnp.float32)[:, None]            # (L, 1)
    div_term = jnp.exp(
        jnp.arange(0, d_model, 2, dtype=jnp.float32) * (-math.log(10000.0) / d_model)
    )                                                                      # (D/2,)
    angles = position * div_term                                           # (L, D/2)
    pe = jnp.zeros((max_len, d_model), dtype=jnp.float32)
    pe = pe.at[:, 0::2].set(jnp.sin(angles))
    pe = pe.at[:, 1::2].set(jnp.cos(angles))
    return pe


def _choose_layout(S: int, D: int) -> tuple[int, int]:
    """Factor the per-batch (S, D) slab into (rows, lanes) with lanes lane-dense."""
    total = S * D
    if D % _LANE == 0:
        return S, D                          # already lane-dense
    if total % _LANE == 0:
        best = _LANE
        cap = min(total, _MAX_LANE_WIDTH)
        for cand in range(_LANE, cap + 1, _LANE):
            if total % cand == 0:
                best = cand                  # largest 128-multiple divisor <= cap
        return total // best, best
    # Fallback: full-extent last dim (masked partial stores) but still correct.
    return S, D


def _choose_tiles(B: int, R: int, L: int, itemsize: int, with_bits: bool):
    """Pick (TB, TR) so the per-step payload stays within the byte budget."""
    bytes_per_elem = 2 * itemsize + (4 if with_bits else 0)   # x + out (+ u32 bits)
    row_bytes = L * bytes_per_elem
    sub = max(8, 32 // itemsize)              # sublane multiple: 8/16/32 rows
    slab_bytes = R * row_bytes

    if slab_bytes <= _STEP_PAYLOAD_BUDGET:
        # Whole per-batch slab fits -> amortize the per-step overhead over batch.
        TR = R
        TB = max(1, min(B, _STEP_PAYLOAD_BUDGET // max(1, slab_bytes)))
    else:
        TB = 1
        cap = max(1, _STEP_PAYLOAD_BUDGET // row_bytes)
        if cap >= sub:
            cap = (cap // sub) * sub
        TR = cap
        # Prefer an exact divisor of R (no masked tail tile).
        for cand in range(min(cap, R), 0, -1):
            if R % cand == 0 and cand % sub == 0:
                TR = cand
                break
        if TR != R and TR % 8 != 0:           # keep (8,128)-valid block shape
            TR = min(R, ((TR + 7) // 8) * 8)

    n_r = pl.cdiv(R, TR)
    n_b = pl.cdiv(B, TB)
    # Keep >= 2 grid steps so v7x can shard the 'parallel' axes over its 2 TCs.
    if n_r * n_b == 1 and B >= 2:
        TB = (B + 1) // 2
        n_b = pl.cdiv(B, TB)
    return TB, TR, n_r, n_b


def _posenc_add_kernel(x_ref, pe_ref, o_ref):
    # x_ref: (TB, TR, L); pe_ref: (TR, L) broadcast over the batch tile.
    o_ref[...] = (x_ref[...] + pe_ref[...]).astype(o_ref.dtype)


def _posenc_dropout_kernel(x_ref, pe_ref, bits_ref, o_ref, *, keep_prob):
    y = x_ref[...] + pe_ref[...]
    # 24-bit threshold compare on raw PRNG bits (signed compare -> portable).
    r24 = (bits_ref[...] >> jnp.uint32(8)).astype(jnp.int32)
    thresh = jnp.int32(min(int(round(keep_prob * float(1 << 24))), (1 << 24) - 1))
    keep = r24 < thresh
    # Scale in f32, single cast at the store (avoids bf16-rounded 1/keep_prob).
    y32 = y.astype(jnp.float32) * jnp.float32(1.0 / keep_prob)
    o_ref[...] = jnp.where(keep, y32, jnp.float32(0.0)).astype(o_ref.dtype)


def positional_encoding_forward(
    x: jnp.ndarray,
    pe_table: jnp.ndarray,
    pos: int | None = None,
    *,
    dropout_p: float = 0.1,
    training: bool = False,
    seed: int = 0,
) -> jnp.ndarray:
    """x: [B, S, D] (batch_first=True). Returns dropout(x + pe)."""
    B, S, D = x.shape
    apply_dropout = bool(training and dropout_p > 0.0)
    keep_prob = float(1.0 - dropout_p)

    if pos is not None:
        # Single-token decode step: plain JAX is cheaper than a Pallas launch
        # of tiny (1, 1, D) blocks (pure per-step pipeline overhead).
        assert S == 1, "Pos is available only for one-token input"
        pe_slice = jax.lax.dynamic_slice(pe_table, (pos, 0), (1, D))       # (1, D)
        y = x + pe_slice[None].astype(x.dtype)                             # (B,1,D)
        if apply_dropout:
            bits = jax.random.bits(jax.random.PRNGKey(seed), y.shape, dtype=jnp.uint32)
            thresh = min(int(round(keep_prob * float(1 << 24))), (1 << 24) - 1)
            keep = (bits >> 8).astype(jnp.int32) < thresh
            y = jnp.where(keep, y.astype(jnp.float32) * jnp.float32(1.0 / keep_prob), 0.0)
        return y.astype(x.dtype)

    # --- main path: dropout(x + pe[:S]) over the whole sequence -------------
    pe_slice = pe_table[:S].astype(x.dtype)                                # (S, D)

    R, L = _choose_layout(S, D)            # lane-dense view of the (S, D) slab
    x2 = x.reshape(B, R, L)                # contiguous row-major reshape (bitcast)
    pe2 = pe_slice.reshape(R, L)

    itemsize = jnp.dtype(x.dtype).itemsize
    TB, TR, n_r, n_b = _choose_tiles(B, R, L, itemsize, apply_dropout)

    # Batch is the fastest-varying grid axis -> the pe tile's block index is
    # constant across consecutive steps (stays resident, no re-DMA).
    x_spec = pl.BlockSpec((TB, TR, L), lambda r, b: (b, r, 0))
    pe_spec = pl.BlockSpec((TR, L), lambda r, b: (r, 0))

    cost = pl.CostEstimate(
        flops=B * S * D,
        transcendentals=0,
        bytes_accessed=(2 * B * S * D * itemsize + S * D * itemsize
                        + (4 * B * S * D if apply_dropout else 0)),
    )
    cparams = pltpu.CompilerParams(
        dimension_semantics=("parallel", "parallel"),
        vmem_limit_bytes=32 * 1024 * 1024,   # headroom over v5e's 16 MiB default
    )

    if apply_dropout:
        bits = jax.random.bits(
            jax.random.PRNGKey(seed), (B, S, D), dtype=jnp.uint32
        ).reshape(B, R, L)
        out2 = pl.pallas_call(
            partial(_posenc_dropout_kernel, keep_prob=keep_prob),
            out_shape=jax.ShapeDtypeStruct((B, R, L), x.dtype),
            grid=(n_r, n_b),
            in_specs=[x_spec, pe_spec, x_spec],
            out_specs=x_spec,
            compiler_params=cparams,
            cost_estimate=cost,
        )(x2, pe2, bits)
    else:
        out2 = pl.pallas_call(
            _posenc_add_kernel,
            out_shape=jax.ShapeDtypeStruct((B, R, L), x.dtype),
            grid=(n_r, n_b),
            in_specs=[x_spec, pe_spec],
            out_specs=x_spec,
            compiler_params=cparams,
            cost_estimate=cost,
        )(x2, pe2)

    return out2.reshape(B, S, D)


if __name__ == "__main__":
    key = jax.random.PRNGKey(0)
    B, S, D = 2, 8, 32
    max_len = 3072

    x = jax.random.normal(key, (B, S, D), dtype=jnp.float32)
    pe_table = make_pe_table(D, max_len)
    ref = x + pe_table[:S][None, :, :]

    # --- eval-mode forward (dropout = identity), matches module.eval() ------
    out = positional_encoding_forward(x, pe_table, pos=None,
                                      dropout_p=0.1, training=False)
    out = jax.block_until_ready(out)
    assert out.shape == (B, S, D)
    assert jnp.allclose(out, ref, atol=1e-6), "mismatch vs reference (eval path)"

    # --- training-mode forward: exact mask reference from the same bits -----
    drop_p, seed_tr = 0.1, 123
    keep_prob = 1.0 - drop_p
    out_tr = positional_encoding_forward(x, pe_table, pos=None,
                                         dropout_p=drop_p, training=True,
                                         seed=seed_tr)
    out_tr = jax.block_until_ready(out_tr)
    bits_ref = jax.random.bits(jax.random.PRNGKey(seed_tr), (B, S, D),
                               dtype=jnp.uint32)
    thresh = min(int(round(keep_prob * float(1 << 24))), (1 << 24) - 1)
    keep_ref = (bits_ref >> 8).astype(jnp.int32) < thresh
    ref_tr = jnp.where(keep_ref, ref * jnp.float32(1.0 / keep_prob), 0.0)
    assert jnp.allclose(out_tr, ref_tr, atol=1e-5), \
        "mismatch vs reference (dropout path)"

    # --- lane-dense D path (D multiple of 128) ------------------------------
    D2 = 128
    x128 = jax.random.normal(jax.random.PRNGKey(2), (B, 16, D2), dtype=jnp.float32)
    pe128 = make_pe_table(D2, max_len)
    out128 = jax.block_until_ready(
        positional_encoding_forward(x128, pe128, dropout_p=0.1, training=False))
    ref128 = x128 + pe128[:16][None, :, :]
    assert jnp.allclose(out128, ref128, atol=1e-6), "mismatch vs reference (D=128)"

    # --- pos= path (single-token input), pure-JAX fast path ------------------
    x1 = jax.random.normal(jax.random.PRNGKey(1), (B, 1, D), dtype=jnp.float32)
    out1 = jax.block_until_ready(
        positional_encoding_forward(x1, pe_table, pos=5,
                                    dropout_p=0.1, training=False))
    ref1 = x1 + pe_table[5][None, None, :]
    assert jnp.allclose(out1, ref1, atol=1e-6), "mismatch vs reference (pos path)"

    print("KERNEL_OK")
</pallas_src>

<mosaic_0001>
module attributes {stable_mosaic.version = 11 : i64} {
  func.func @_posenc_add_kernel(%arg0: i32, %arg1: i32, %arg2: memref<1x1x256xf32, #tpu.memory_space<vmem>>, %arg3: memref<1x256xf32, #tpu.memory_space<vmem>>, %arg4: memref<1x1x256xf32, #tpu.memory_space<vmem>>) attributes {dimension_semantics = [#tpu.dimension_semantics<parallel>, #tpu.dimension_semantics<parallel>], iteration_bounds = array<i64: 1, 2>, scalar_prefetch = 0 : i64, scratch_operands = 0 : i64, tpu.core_type = #tpu.core_type<tc>, window_params = [{transform_indices = @transform_0, window_bounds = array<i64: 1, 1, 256>}, {transform_indices = @transform_1, window_bounds = array<i64: 1, 256>}, {transform_indices = @transform_2, window_bounds = array<i64: 1, 1, 256>}]} {
    %c0 = arith.constant 0 : index
    %c0_0 = arith.constant 0 : index
    %c0_1 = arith.constant 0 : index
    %0 = vector.load %arg2[%c0, %c0_0, %c0_1] : memref<1x1x256xf32, #tpu.memory_space<vmem>>, vector<1x1x256xf32>
    %c0_2 = arith.constant 0 : index
    %c0_3 = arith.constant 0 : index
    %1 = vector.load %arg3[%c0_2, %c0_3] : memref<1x256xf32, #tpu.memory_space<vmem>>, vector<1x256xf32>
    %2 = vector.shape_cast %1 : vector<1x256xf32> to vector<1x1x256xf32>
    %3 = arith.addf %0, %2 : vector<1x1x256xf32>
    %c0_4 = arith.constant 0 : index
    %c0_5 = arith.constant 0 : index
    %c0_6 = arith.constant 0 : index
    %4 = vector.load %arg4[%c0_4, %c0_5, %c0_6] : memref<1x1x256xf32, #tpu.memory_space<vmem>>, vector<1x1x256xf32>
    tpu.vector_store %arg4[%c0_4, %c0_5, %c0_6], %3 {strides = array<i32>} : memref<1x1x256xf32, #tpu.memory_space<vmem>>, vector<1x1x256xf32>,
    return
  }
  func.func @transform_0(%arg0: i32, %arg1: i32) -> (i32, i32, i32) {
    %c0_i32 = arith.constant 0 : i32
    %c0_i32_0 = arith.constant 0 : i32
    return %arg1, %arg0, %c0_i32 : i32, i32, i32
  }
  func.func @transform_1(%arg0: i32, %arg1: i32) -> (i32, i32) {
    %c0_i32 = arith.constant 0 : i32
    %c0_i32_0 = arith.constant 0 : i32
    return %arg0, %c0_i32 : i32, i32
  }
  func.func @transform_2(%arg0: i32, %arg1: i32) -> (i32, i32, i32) {
    %c0_i32 = arith.constant 0 : i32
    %c0_i32_0 = arith.constant 0 : i32
    return %arg1, %arg0, %c0_i32 : i32, i32, i32
  }
}

</mosaic_0001>

<bundles_post_ra>
// kernel: tpu_custom_call.1
= control target key start
LH: loop header
LB: loop body
LE: loop exit
PB: predicated region body
PF: predicated region fallthrough
CT: control target
= control target key end

     0   :  { %7 = vsyncpa [#allocation3], 0  ;;  %s705_s0 = inlined_call_operand.hbm [shape: f32[2,1,256], index: 0, kind: input, shape index: {}]   ;;  %s706_s1 = inlined_call_operand.vmem [shape: f32[1,256], index: 1, kind: input, shape index: {}]   ;;  %s707_s2 = inlined_call_operand.hbm [shape: f32[2,1,256], index: 2, kind: output, shape index: {}]  }
   0x1   :  { %9 = vsyncpa [#allocation3 + $0x1], 0 }
   0x2   :  { %10 = vsyncpa [#allocation4], 0 }
   0x3   :  { %12 = vsyncpa [#allocation4 + $0x1], 0  ;;  %s530_s9 = smov 0   ;;  %s532_s10 = smov 0  }
   0x4   :  { %s534_s11 = smov 0   ;;  %s536_s12 = smov 0  }
   0x5   :  { %s538_s13 = smov 0   ;;  %s540_s14 = smov 0  }
   0x6 LB: > { %s319_s15 = sadd.s32 4294967295, %s511_s14   ;;  %s320_s16 = sadd.s32 4294967294, %s511_s14   ;;  %s511_s14 = sphi %s540_s14, %s18_s14   ;;  %s507_s13 = sphi %s538_s13, %s723_s13   ;;  %s503_s12 = sphi %s536_s12, %s722_s12   ;;  %s499_s11 = sphi %s534_s11, %s721_s11   ;;  %s495_s10 = sphi %s532_s10, %s720_s10   ;;  %s491_s9 = sphi %s530_s9, %s719_s9  }
   0x7   : > { %s27_s17 = sadd.s32 1, %s507_s13  ;;  %s39_s18 = sadd.s32 1, %s499_s11 }
   0x8   : > { %p28_p0 = scmp.ge.s32.totalorder %s27_s17, 2  ;;  %p46_p1 = scmp.ne.s32.totalorder %s499_s11, %s495_s10 }
   0x9   : > { %p47_p2 = scmp.eq.s32.totalorder %s511_s14, 0  ;;  %p52_p3 = scmp.ne.s32.totalorder %s495_s10, %s491_s9 }
   0xa   : > { %s725_s17 = smov (%p28_p0, %s27_s17), 0  ;;  %p53_p5 = scmp.eq.s32.totalorder %s319_s15, 0 }
   0xb   : > { %p571_p4 = por %p47_p2, %p46_p1  ;;  %s34_s20 = ssub.s32 %s507_s13, %s725_s17 }
   0xc   : > { %p104_p6 = scmp.eq.s32.totalorder %s319_s15, 1  ;;  %p37_p7 = scmp.eq.s32.totalorder %s34_s20, 0 }
   0xd   : > { %p577_p8 = por %p53_p5, %p52_p3  ;;  %p110_p10 = scmp.eq.s32.totalorder %s320_s16, 1 }
   0xe   : > { %p581_p9 = por %p104_p6, %p46_p1  ;;  %p349_p13 = scmp.lt.s32.totalorder %s511_s14, 2 }
   0xf   : > { %s586_s23 = scalar_select %p37_p7, %s499_s11, %s39_s18  }
  0x10   : > { %s711_s22 = scalar_select %p581_p9, 1, 0 }
  0x11   : > { %p588_p11 = por %p110_p10, %p52_p3  ;;  %s137_s25 = sand.u32 1, %s499_s11  }
  0x12   : > { %s324_s26 = sshll.u32 %s137_s25, 1  ;;  %s335_s27 = sshll.u32 %s507_s13, 5 }
  0x13   : > { %s712_s24 = scalar_select %p588_p11, 1, 0 }
  0x14   : > { %s599_s30 = scalar_lea.hbm %s705_s0, %s335_s27  ;;  %s141_s3 = scalar_lea.vmem [#allocation2], %s324_s26 }
  0x15   : > { %s151_s4 = sshll.u32 %s141_s3, 4  ;;  %p605_p0 = pnand %p349_p13, %p571_p4  ;;  %s601_s4 = int_to_ptr.vmem [resolvable:$true] %s151_s4 }
  0x16   : > { %s138_s6 = scalar_lea.sflag [#allocation3], %s137_s25  ;;  %s399_s7 = scalar_lea.hbm %s599_s30, 32 }
  0x17   : > { %p400_p3 = scmp.ne.s32.totalorder %s599_s30, %s399_s7  ;;  %p401_p5 = pneg %p605_p0 }
  0x18   : > { %s404_s16 = scalar_lea.hbm %s705_s0, 64  ;;  %p405_p4 = scmp.lt.u32.totalorder %s599_s30, %s705_s0 }
  0x19   : > { %p402_p6 = pnand %p401_p5, %p400_p3  ;;  %p406_p10 = scmp.lt.u32.totalorder %s404_s16, %s399_s7 }
  0x1a   : > { %p408_p12 = scmp.lt.u32.totalorder %s399_s7, %s599_s30 }
  0x1b   : > { %p403_p7 = pneg %p402_p6  ;;  %p407_p13 = por %p406_p10, %p405_p4 }
  0x1d   : > { %p409_p1 = por %p408_p12, %p407_p13 }
  0x1f   : > { %p410_p2 = pnand %p409_p1, %p403_p7 }
  0x21   : > { %413 = shalt.err (!%p410_p2)
}
  0x22   : > { %s414_s20 = scalar_lea.vmem %s601_s4, 32  ;;  %s513_s25 = smov [#allocation2]  }
  0x23   : > { %p415_p3 = scmp.ne.s32.totalorder %s601_s4, %s414_s20  ;;  %s419_s26 = sshll.u32 %s513_s25, 4  ;;  %s420_s26 = int_to_ptr.vmem [resolvable:$false] %s419_s26 }
  0x24   : > { %s421_s27 = scalar_lea.vmem %s420_s26, 64  ;;  %p422_p9 = scmp.lt.s32.totalorder %s601_s4, %s420_s26 }
  0x25   : > { %p417_p6 = pnand %p415_p3, %p401_p5  ;;  %p423_p4 = scmp.lt.s32.totalorder %s421_s27, %s414_s20 }
  0x27   : > { %p418_p11 = pneg %p417_p6  ;;  %p424_p10 = por %p423_p4, %p422_p9 }
  0x29   : > { %p425_p12 = pnand %p424_p10, %p418_p11 }
  0x2b   : > { %428 = shalt.err (!%p425_p12)
}
  0x2c   : > { %344 = dma.hbm_to_vmem [thread:$0]  (!%p605_p0), %s599_s30, 32, %s601_s4, %s138_s6  }
  0x2d   : > { %p714_p1 = scmp.lt.s32.totalorder %s511_s14, 3  ;;  %p715_p2 = scmp.ge.s32.totalorder %s511_s14, 1 }
  0x2f   : > { %p157_p5 = pnand %p715_p2, %p714_p1 }
  0x30   : > { %s641_s28 = sand.u32 (!%p157_p5), 1, %s495_s10  }
  0x31   : > { %160 = sbr.rel (%p157_p5) target bundleno = 83 (0x53), region = 28  ;;  %s328_s29 = sshll.u32 (!%p157_p5), %s641_s28, 1 }
  0x32   : > { %s163_s3 = scalar_lea.sflag (!%p157_p5), [#allocation3], %s641_s28  ;;  %s166_s7 = scalar_lea.vmem (!%p157_p5), [#allocation2], %s328_s29 }
  0x38   : > { %482 = dma.done.wait (%p577_p8), %s163_s3, 32  }
  0x39   : > { %484 = vsyncadd (%p577_p8), %s163_s3, 4294967264  ;;  %v198_v0 = vlaneseq  ;;  %s190_s30 = scalar_lea.vmem [#allocation5], %s328_s29  ;;  %s336_s5 = sshll.u32 %s503_s12, 5  ;;  %v195_v1 = vld [vmem:[%s166_s7] sm:$0x3] }
  0x3a   : > { %s220_s4 = sshll.u32 %s190_s30, 4  ;;  %v196_v2 = vld [vmem:[%s706_s1] sm:$0x3]  ;;  %s658_s21 = scalar_lea.hbm %s707_s2, %s336_s5  ;;  %s653_s4 = int_to_ptr.vmem [resolvable:$true] %s220_s4 }
  0x3b   : > { %vm200_vm0 = vcmp.lt.s32.totalorder %v198_v0, 256  ;;  %v197_v3 = vadd.f32 %v196_v2, %v195_v1  ;;  %s204_s18 = scalar_lea.sflag [#allocation4], %s641_s28  ;;  %s429_s12 = scalar_lea.vmem %s653_s4, 32 }
  0x3c   : > { %p430_p8 = scmp.ne.s32.totalorder %s653_s4, %s429_s12  ;;  %p716_p9 = scmp.ne.s32.totalorder %s711_s22, 0 }
  0x3d   : > { %202 = vst.msk [vmem:[%s190_s30] sm:$0x3] %vm200_vm0, %v197_v3  ;;  %s514_s19 = smov [#allocation5]  }
  0x3e   : > { %p431_p11 = pnand %p430_p8, %p716_p9  ;;  %s433_s20 = sshll.u32 %s514_s19, 4  ;;  %s434_s20 = int_to_ptr.vmem [resolvable:$false] %s433_s20 }
  0x3f   : > { %s435_s25 = scalar_lea.vmem %s434_s20, 64  ;;  %p436_p7 = scmp.lt.s32.totalorder %s653_s4, %s434_s20 }
  0x40   : > { %p432_p0 = pneg %p431_p11  ;;  %p437_p13 = scmp.lt.s32.totalorder %s435_s25, %s429_s12 }
  0x42   : > { %p438_p3 = por %p437_p13, %p436_p7 }
  0x44   : > { %p439_p6 = pnand %p438_p3, %p432_p0 }
  0x46   : > { %442 = shalt.err (!%p439_p6)
}
  0x47   : > { %s443_s26 = scalar_lea.hbm %s658_s21, 32  ;;  %s447_s29 = scalar_lea.hbm %s707_s2, 64 }
  0x48   : > { %p444_p4 = scmp.ne.s32.totalorder %s658_s21, %s443_s26  ;;  %p448_p1 = scmp.lt.u32.totalorder %s658_s21, %s707_s2 }
  0x49   : > { %p449_p2 = scmp.lt.u32.totalorder %s447_s29, %s443_s26  ;;  %p451_p8 = scmp.lt.u32.totalorder %s443_s26, %s658_s21 }
  0x4a   : > { %p445_p10 = pnand %p444_p4, %p716_p9 }
  0x4b   : > { %p450_p5 = por %p449_p2, %p448_p1 }
  0x4c   : > { %p446_p12 = pneg %p445_p10 }
  0x4d   : > { %p452_p11 = por %p451_p8, %p450_p5 }
  0x4f   : > { %p453_p0 = pnand %p452_p11, %p446_p12 }
  0x51   : > { %456 = shalt.err (!%p453_p0)
}
  0x52   : > { %339 = dma.vmem_to_hbm [thread:$0]  (%p716_p9), %s653_s4, 32, %s658_s21, %s204_s18  }
  0x53 PF: > { %s232_s30 = sand.u32 1, %s491_s9   ;;  %p717_p7 = scmp.ne.s32.totalorder %s712_s24, 0 }
  0x54   : > { %p718_p13 = scmp.ge.s32.totalorder %s511_s14, 2  ;;  %s233_s5 = scalar_lea.sflag [#allocation4], %s232_s30 }
  0x56   : > { %p346_p3 = pnand %p718_p13, %p717_p7 }
  0x58   : > { %486 = dma.done.wait (!%p346_p3), %s233_s5, 32  }
  0x59   : > { %488 = vsyncadd (!%p346_p3), %s233_s5, 4294967264  ;;  %s18_s14 = sadd.s32 1, %s511_s14   ;;  %s719_s9 = smov %s495_s10 }
  0x5a   : > { %p15_p6 = scmp.ge.s32.totalorder %s18_s14, 4   ;;  %s720_s10 = smov %s499_s11 }
  0x5b   : > { %s721_s11 = smov %s586_s23  ;;  %s722_s12 = smov %s507_s13 }
  0x5c   : > { %s723_s13 = smov %s725_s17  ;;  %17 = sbr.rel (!%p15_p6) target bundleno = 6 (0x6), region = 76 }
  0x63   :  { %238 = vsyncpa [#allocation3], 1 }
  0x64   :  { %240 = vsyncpa [#allocation3 + $0x1], 1 }
  0x65   :  { %241 = vsyncpa [#allocation4], 1 }
  0x66   :  { %243 = vsyncpa [#allocation4 + $0x1], 1 }

</bundles_post_ra>
